<compile_context>
chip_gen: v6e
topology: v6e:2x2x1
jax: 0.10.0
libtpu: 0.0.40
codegen_flags: <defaults>
</compile_context>

<pallas_src>
import functools

import jax
import jax.numpy as jnp
from jax.experimental import pallas as pl
from jax.experimental.pallas import tpu as pltpu

_LANE = 128      # lane width (last dim)
_SUBLANE = 8     # sublane width (second-to-last dim)


def _round_up(n, m):
    return ((n + m - 1) // m) * m


# ----------------------------------------------------------------------------
# Fused kernel: all layers, activation resident in VMEM/vregs.
#   x_ref : (TILE_B, DIN_PAD) f32  zero-padded input activations
#   refs  : (w_0, s_0, w_1, s_1, ..., w_{L-1}, s_{L-1}, o_ref)
#     w_l : (din_pad_l, dout_pad_l) bf16  BN-scale-folded weights (in, out)
#     s_l : (1, dout_pad_l)         f32   folded bias/BN shift
#   o_ref : (TILE_B, DOUT_PAD_LAST) f32
# Padded lanes stay exactly zero through every layer (zero weight rows/cols,
# zero shift, ReLU(0) == 0), so no masking is needed inside the kernel.
# ----------------------------------------------------------------------------
def _mia_fused_kernel(x_ref, *refs, num_layers):
    o_ref = refs[-1]
    act = x_ref[...]                                   # f32
    for l in range(num_layers):                        # static unroll; L small
        w_ref = refs[2 * l]
        s_ref = refs[2 * l + 1]
        y = jnp.dot(act.astype(jnp.bfloat16), w_ref[...],
                    preferred_element_type=jnp.float32)   # bf16 MXU, f32 acc
        act = jnp.maximum(y + s_ref[...], 0.0)             # +shift, ReLU (f32)
    o_ref[...] = act


# ----------------------------------------------------------------------------
# Wrapper: minimal padding, batch tiling, single pallas_call, slice result.
# ----------------------------------------------------------------------------
def mia_model_forward(x, w_list, shift_list, num_classes):
    B, din = x.shape
    L = len(w_list)
    din_pad = w_list[0].shape[0]          # round_up(din, 128)
    dout_pad = w_list[-1].shape[1]        # round_up(num_classes, 128)

    # Batch tiling:
    #  - small B: one tile (sublane-padded)
    #  - moderate B: split into >=2 tiles so both v7x TensorCores get work
    #  - large B: 512-row tiles (~85% of HBM roofline vs ~63% at 256)
    if B <= 64:
        tile_b = _round_up(B, _SUBLANE)
    elif B <= 512:
        tile_b = _round_up((B + 1) // 2, _SUBLANE)
    else:
        tile_b = 512
    b_pad = _round_up(B, tile_b)
    grid_b = b_pad // tile_b

    x = x.astype(jnp.float32)
    if b_pad != B or din_pad != din:
        x = jnp.pad(x, ((0, b_pad - B), (0, din_pad - din)))

    # VMEM budget: double-buffered x/out tiles, single-buffered bf16 weights
    # and f32 shifts, plus headroom for the f32 activation temporaries.
    max_w = max(max(w.shape) for w in w_list)
    vmem_need = (2 * tile_b * din_pad * 4
                 + 2 * tile_b * dout_pad * 4
                 + sum(int(w.size) * 2 for w in w_list)
                 + sum(int(s.size) * 4 for s in shift_list)
                 + 4 * tile_b * max_w * 4)
    vmem_limit = min(max(int(vmem_need * 1.5) + (2 << 20), 16 << 20), 48 << 20)

    in_specs = [pl.BlockSpec((tile_b, din_pad), lambda i: (i, 0))]
    operands = [x]
    for w, s in zip(w_list, shift_list):
        dpi, dpo = w.shape
        # Constant index_map -> fetched once; single-buffer to halve VMEM use.
        in_specs.append(pl.BlockSpec((dpi, dpo), lambda i: (0, 0),
                                     pipeline_mode=pl.Buffered(1)))
        in_specs.append(pl.BlockSpec((1, dpo), lambda i: (0, 0),
                                     pipeline_mode=pl.Buffered(1)))
        operands += [w, s]

    out_pad = pl.pallas_call(
        functools.partial(_mia_fused_kernel, num_layers=L),
        out_shape=jax.ShapeDtypeStruct((b_pad, dout_pad), jnp.float32),
        grid=(grid_b,),
        in_specs=in_specs,
        out_specs=pl.BlockSpec((tile_b, dout_pad), lambda i: (i, 0)),
        compiler_params=pltpu.CompilerParams(
            dimension_semantics=("parallel",),   # batch tiles independent
            vmem_limit_bytes=vmem_limit,
        ),
    )(*operands)

    return out_pad[:B, :num_classes]


# ----------------------------------------------------------------------------
# Parameter construction (mirrors MiaModel.__init__/init_weights, eval mode).
#   Linear: weight ~ N(0, 0.001), bias = 0
#   BatchNorm1d: gamma=1, beta=0, running_mean=0, running_var=1, eps=1e-5
# BN scale is folded into the weights on the host, once.
# ----------------------------------------------------------------------------
def make_mia_params(key, model_config, num_classes):
    dims = list(model_config) + [num_classes]
    eps = 1e-5
    layers = []
    for i in range(len(dims) - 1):
        din, dout = dims[i], dims[i + 1]
        key, sub = jax.random.split(key)
        w = 0.001 * jax.random.normal(sub, (din, dout), dtype=jnp.float32)  # (in,out)
        b = jnp.zeros((dout,), jnp.float32)
        gamma = jnp.ones((dout,), jnp.float32)
        beta = jnp.zeros((dout,), jnp.float32)
        r_mean = jnp.zeros((dout,), jnp.float32)
        r_var = jnp.ones((dout,), jnp.float32)
        scale = gamma / jnp.sqrt(r_var + eps)            # (dout,)
        w_folded = w * scale[None, :]                    # fold BN scale into W
        shift = (b - r_mean) * scale + beta              # folded bias/BN shift
        layers.append(dict(w=w_folded, shift=shift))
    return layers


def pack_mia_params(layers):
    """Per-layer lane-padded bf16 weights and f32 shifts (lists)."""
    w_list, shift_list = [], []
    for l in layers:
        din, dout = l["w"].shape
        dpi, dpo = _round_up(din, _LANE), _round_up(dout, _LANE)
        w = jnp.zeros((dpi, dpo), jnp.float32).at[:din, :dout].set(l["w"])
        s = jnp.zeros((1, dpo), jnp.float32).at[0, :dout].set(l["shift"])
        w_list.append(w.astype(jnp.bfloat16))
        shift_list.append(s)
    return w_list, shift_list


# ----------------------------------------------------------------------------
# Pure-JAX f32 reference for sanity checking (unpadded).
# ----------------------------------------------------------------------------
def mia_model_ref(x, layers):
    out = x
    for l in layers:
        out = jnp.maximum(out @ l["w"] + l["shift"], 0.0)
    return out


if __name__ == "__main__":
    # model_config = [in_features, hidden...]; num_classes = 2
    model_config = [32, 64, 32]
    num_classes = 2
    batch = 8

    key = jax.random.PRNGKey(0)
    kx, kp = jax.random.split(key)
    x = jax.random.normal(kx, (batch, model_config[0]), dtype=jnp.float32)

    layers = make_mia_params(kp, model_config, num_classes)
    w_list, shift_list = pack_mia_params(layers)

    forward = jax.jit(mia_model_forward, static_argnames=("num_classes",))
    out = forward(x, w_list, shift_list, num_classes)
    out = jax.block_until_ready(out)

    ref = mia_model_ref(x, layers)
    assert out.shape == (batch, num_classes), out.shape
    # bf16 MXU operands -> loose relative tolerance (logits are ~1e-5 scale).
    assert jnp.allclose(out, ref, atol=1e-6, rtol=5e-2), (out, ref)

    print("KERNEL_OK")
</pallas_src>

<mosaic_0001>
module attributes {stable_mosaic.version = 11 : i64} {
  func.func @_mia_fused_kernel(%arg0: i32, %arg1: memref<8x128xf32, #tpu.memory_space<vmem>>, %arg2: memref<128x128xbf16, #tpu.memory_space<vmem>>, %arg3: memref<1x128xf32, #tpu.memory_space<vmem>>, %arg4: memref<128x128xbf16, #tpu.memory_space<vmem>>, %arg5: memref<1x128xf32, #tpu.memory_space<vmem>>, %arg6: memref<128x128xbf16, #tpu.memory_space<vmem>>, %arg7: memref<1x128xf32, #tpu.memory_space<vmem>>, %arg8: memref<8x128xf32, #tpu.memory_space<vmem>>) attributes {dimension_semantics = [#tpu.dimension_semantics<parallel>], iteration_bounds = array<i64: 1>, scalar_prefetch = 0 : i64, scratch_operands = 0 : i64, tpu.core_type = #tpu.core_type<tc>, window_params = [{transform_indices = @transform_0, window_bounds = array<i64: 8, 128>}, {pipeline_mode = #tpu.pipeline_mode<synchronous>, transform_indices = @transform_1, window_bounds = array<i64: 128, 128>}, {pipeline_mode = #tpu.pipeline_mode<synchronous>, transform_indices = @transform_2, window_bounds = array<i64: 1, 128>}, {pipeline_mode = #tpu.pipeline_mode<synchronous>, transform_indices = @transform_3, window_bounds = array<i64: 128, 128>}, {pipeline_mode = #tpu.pipeline_mode<synchronous>, transform_indices = @transform_4, window_bounds = array<i64: 1, 128>}, {pipeline_mode = #tpu.pipeline_mode<synchronous>, transform_indices = @transform_5, window_bounds = array<i64: 128, 128>}, {pipeline_mode = #tpu.pipeline_mode<synchronous>, transform_indices = @transform_6, window_bounds = array<i64: 1, 128>}, {transform_indices = @transform_7, window_bounds = array<i64: 8, 128>}]} {
    %c0 = arith.constant 0 : index
    %c0_0 = arith.constant 0 : index
    %0 = vector.load %arg1[%c0, %c0_0] : memref<8x128xf32, #tpu.memory_space<vmem>>, vector<8x128xf32>
    %1 = arith.truncf %0 : vector<8x128xf32> to vector<8x128xbf16>
    %c0_1 = arith.constant 0 : index
    %c0_2 = arith.constant 0 : index
    %2 = vector.load %arg2[%c0_1, %c0_2] : memref<128x128xbf16, #tpu.memory_space<vmem>>, vector<128x128xbf16>
    %cst = arith.constant dense<0.000000e+00> : vector<8x128xf32>
    %3 = tpu.matmul %1, %2, %cst {dimension_numbers = #tpu.dot_dimension_numbers<[1], [0], [0], [1], [0, 0, 1, 1], [], []>} : vector<8x128xbf16>, vector<128x128xbf16>, vector<8x128xf32> -> vector<8x128xf32>
    %c0_3 = arith.constant 0 : index
    %c0_4 = arith.constant 0 : index
    %4 = vector.load %arg3[%c0_3, %c0_4] : memref<1x128xf32, #tpu.memory_space<vmem>>, vector<1x128xf32>
    %5 = vector.broadcast %4 : vector<1x128xf32> to vector<8x128xf32>
    %6 = arith.addf %3, %5 : vector<8x128xf32>
    %cst_5 = arith.constant 0.000000e+00 : f32
    %7 = vector.broadcast %cst_5 : f32 to vector<8x128xf32>
    %8 = arith.maximumf %6, %7 : vector<8x128xf32>
    %9 = arith.truncf %8 : vector<8x128xf32> to vector<8x128xbf16>
    %c0_6 = arith.constant 0 : index
    %c0_7 = arith.constant 0 : index
    %10 = vector.load %arg4[%c0_6, %c0_7] : memref<128x128xbf16, #tpu.memory_space<vmem>>, vector<128x128xbf16>
    %cst_8 = arith.constant dense<0.000000e+00> : vector<8x128xf32>
    %11 = tpu.matmul %9, %10, %cst_8 {dimension_numbers = #tpu.dot_dimension_numbers<[1], [0], [0], [1], [0, 0, 1, 1], [], []>} : vector<8x128xbf16>, vector<128x128xbf16>, vector<8x128xf32> -> vector<8x128xf32>
    %c0_9 = arith.constant 0 : index
    %c0_10 = arith.constant 0 : index
    %12 = vector.load %arg5[%c0_9, %c0_10] : memref<1x128xf32, #tpu.memory_space<vmem>>, vector<1x128xf32>
    %13 = vector.broadcast %12 : vector<1x128xf32> to vector<8x128xf32>
    %14 = arith.addf %11, %13 : vector<8x128xf32>
    %cst_11 = arith.constant 0.000000e+00 : f32
    %15 = vector.broadcast %cst_11 : f32 to vector<8x128xf32>
    %16 = arith.maximumf %14, %15 : vector<8x128xf32>
    %17 = arith.truncf %16 : vector<8x128xf32> to vector<8x128xbf16>
    %c0_12 = arith.constant 0 : index
    %c0_13 = arith.constant 0 : index
    %18 = vector.load %arg6[%c0_12, %c0_13] : memref<128x128xbf16, #tpu.memory_space<vmem>>, vector<128x128xbf16>
    %cst_14 = arith.constant dense<0.000000e+00> : vector<8x128xf32>
    %19 = tpu.matmul %17, %18, %cst_14 {dimension_numbers = #tpu.dot_dimension_numbers<[1], [0], [0], [1], [0, 0, 1, 1], [], []>} : vector<8x128xbf16>, vector<128x128xbf16>, vector<8x128xf32> -> vector<8x128xf32>
    %c0_15 = arith.constant 0 : index
    %c0_16 = arith.constant 0 : index
    %20 = vector.load %arg7[%c0_15, %c0_16] : memref<1x128xf32, #tpu.memory_space<vmem>>, vector<1x128xf32>
    %21 = vector.broadcast %20 : vector<1x128xf32> to vector<8x128xf32>
    %22 = arith.addf %19, %21 : vector<8x128xf32>
    %cst_17 = arith.constant 0.000000e+00 : f32
    %23 = vector.broadcast %cst_17 : f32 to vector<8x128xf32>
    %24 = arith.maximumf %22, %23 : vector<8x128xf32>
    %c0_18 = arith.constant 0 : index
    %c0_19 = arith.constant 0 : index
    %25 = vector.load %arg8[%c0_18, %c0_19] : memref<8x128xf32, #tpu.memory_space<vmem>>, vector<8x128xf32>
    tpu.vector_store %arg8[%c0_18, %c0_19], %24 {strides = array<i32>} : memref<8x128xf32, #tpu.memory_space<vmem>>, vector<8x128xf32>,
    return
  }
  func.func @transform_0(%arg0: i32) -> (i32, i32) {
    %c0_i32 = arith.constant 0 : i32
    %c0_i32_0 = arith.constant 0 : i32
    return %arg0, %c0_i32 : i32, i32
  }
  func.func @transform_1(%arg0: i32) -> (i32, i32) {
    %c0_i32 = arith.constant 0 : i32
    %c0_i32_0 = arith.constant 0 : i32
    %c0_i32_1 = arith.constant 0 : i32
    return %c0_i32, %c0_i32_0 : i32, i32
  }
  func.func @transform_2(%arg0: i32) -> (i32, i32) {
    %c0_i32 = arith.constant 0 : i32
    %c0_i32_0 = arith.constant 0 : i32
    %c0_i32_1 = arith.constant 0 : i32
    return %c0_i32, %c0_i32_0 : i32, i32
  }
  func.func @transform_3(%arg0: i32) -> (i32, i32) {
    %c0_i32 = arith.constant 0 : i32
    %c0_i32_0 = arith.constant 0 : i32
    %c0_i32_1 = arith.constant 0 : i32
    return %c0_i32, %c0_i32_0 : i32, i32
  }
  func.func @transform_4(%arg0: i32) -> (i32, i32) {
    %c0_i32 = arith.constant 0 : i32
    %c0_i32_0 = arith.constant 0 : i32
    %c0_i32_1 = arith.constant 0 : i32
    return %c0_i32, %c0_i32_0 : i32, i32
  }
  func.func @transform_5(%arg0: i32) -> (i32, i32) {
    %c0_i32 = arith.constant 0 : i32
    %c0_i32_0 = arith.constant 0 : i32
    %c0_i32_1 = arith.constant 0 : i32
    return %c0_i32, %c0_i32_0 : i32, i32
  }
  func.func @transform_6(%arg0: i32) -> (i32, i32) {
    %c0_i32 = arith.constant 0 : i32
    %c0_i32_0 = arith.constant 0 : i32
    %c0_i32_1 = arith.constant 0 : i32
    return %c0_i32, %c0_i32_0 : i32, i32
  }
  func.func @transform_7(%arg0: i32) -> (i32, i32) {
    %c0_i32 = arith.constant 0 : i32
    %c0_i32_0 = arith.constant 0 : i32
    return %arg0, %c0_i32 : i32, i32
  }
}

</mosaic_0001>

<bundles_post_ra>
// kernel: mia_model_forward.1
= control target key start
LH: loop header
LB: loop body
LE: loop exit
PB: predicated region body
PF: predicated region fallthrough
CT: control target
= control target key end

     0   :  { %12 = vsyncpa [#allocation3], 0  ;;  %s725_s0 = inlined_call_operand.vmem [shape: f32[8,128], index: 0, kind: input, shape index: {}]   ;;  %s726_s1 = inlined_call_operand.hbm [shape: bf16[128,128], index: 1, kind: input, shape index: {}]   ;;  %s727_s2 = inlined_call_operand.vmem [shape: f32[1,128], index: 2, kind: input, shape index: {}]   ;;  %s728_s3 = inlined_call_operand.hbm [shape: bf16[128,128], index: 3, kind: input, shape index: {}]   ;;  %s729_s4 = inlined_call_operand.vmem [shape: f32[1,128], index: 4, kind: input, shape index: {}]   ;;  %s730_s5 = inlined_call_operand.hbm [shape: bf16[128,128], index: 5, kind: input, shape index: {}]   ;;  %s731_s6 = inlined_call_operand.vmem [shape: f32[1,128], index: 6, kind: input, shape index: {}]   ;;  %s732_s7 = inlined_call_operand.vmem [shape: f32[8,128], index: 7, kind: output, shape index: {}]  }
   0x1   :  { %13 = vsyncpa [#allocation5], 0  ;;  %s624_s24 = smov [#allocation4]   ;;  %s625_s26 = smov [#allocation2]  }
   0x2   :  { %s35_s25 = sshll.u32 %s624_s24, 4  ;;  %s21_s27 = sshll.u32 %s625_s26, 4  ;;  %s36_s25 = int_to_ptr.vmem [resolvable:$true] %s35_s25  ;;  %s22_s27 = int_to_ptr.vmem [resolvable:$true] %s21_s27 }
   0x3   :  { %s568_s28 = scalar_lea.vmem %s36_s25, 1024  ;;  %p573_p1 = scmp.lt.s32.totalorder %s36_s25, %s36_s25 }
   0x4   :  { %p569_p0 = scmp.ne.s32.totalorder %s36_s25, %s568_s28  ;;  %p574_p2 = scmp.lt.s32.totalorder %s568_s28, %s568_s28 }
   0x6   :  { %p575_p3 = por %p574_p2, %p573_p1 }
   0x8   :  { %p576_p4 = pnand %p575_p3, %p569_p0 }
   0xa   :  { %579 = shalt.err (!%p576_p4)
}
   0xb   :  { %s626_s29 = smov 64   ;;  %s627_s30 = smov 4  }
   0xc   :  { %41 = dma.hbm_to_vmem [thread:$0]  %s728_s3, 1024, %s36_s25, [#allocation5], %s626_s29, %s626_s29, %s627_s30  }
   0xd   :  { %s588_s10 = scalar_lea.vmem %s22_s27, 1024  ;;  %p593_p6 = scmp.lt.s32.totalorder %s22_s27, %s22_s27 }
   0xe   :  { %p589_p5 = scmp.ne.s32.totalorder %s22_s27, %s588_s10  ;;  %p594_p7 = scmp.lt.s32.totalorder %s588_s10, %s588_s10 }
  0x10   :  { %p595_p8 = por %p594_p7, %p593_p6 }
  0x12   :  { %p596_p9 = pnand %p595_p8, %p589_p5 }
  0x14   :  { %599 = shalt.err (!%p596_p9)
}
  0x15   :  { %27 = dma.hbm_to_vmem [thread:$0]  %s726_s1, 1024, %s22_s27, [#allocation3], %s626_s29, %s626_s29, %s627_s30  }
  0x16   :  { %s628_s13 = smov [#allocation6]  }
  0x17   :  { %s49_s14 = sshll.u32 %s628_s13, 4  ;;  %s50_s14 = int_to_ptr.vmem [resolvable:$true] %s49_s14 }
  0x18   :  { %s608_s15 = scalar_lea.vmem %s50_s14, 1024  ;;  %p613_p11 = scmp.lt.s32.totalorder %s50_s14, %s50_s14 }
  0x19   :  { %p609_p10 = scmp.ne.s32.totalorder %s50_s14, %s608_s15  ;;  %p614_p12 = scmp.lt.s32.totalorder %s608_s15, %s608_s15 }
  0x1b   :  { %p615_p13 = por %p614_p12, %p613_p11 }
  0x1d   :  { %p616_p0 = pnand %p615_p13, %p609_p10 }
  0x1f   :  { %619 = shalt.err (!%p616_p0)
}
  0x20   :  { %55 = dma.hbm_to_vmem [thread:$0]  %s730_s5, 1024, %s50_s14, [#allocation5], %s626_s29, %s626_s29, %s627_s30  }
  0x21   :  { %620 = dma.done.wait [#allocation3], 1024  }
  0x22   :  { %621 = vsyncadd [#allocation3], 4294966272 }
  0x23   :  { %622 = dma.done.wait [#allocation5], 2048  }
  0x24   :  { %623 = vsyncadd [#allocation5], 4294965248  ;;  %v629_v0 = vmov 0.0   ;;  %vm630_vm0 = vmmov 0   ;;  %v536_v1 = vld [vmem:[#allocation2 + $0x38] sm:$0xff]   ;;  %v537_v2 = vld [vmem:[#allocation2 + $0x30] sm:$0xff]  }
  0x25   :  { %469 = vmatprep.subr.bf16.mxu0 %v629_v0  ;;  %485 = vmatprep.mubr.msk.bf16.mxu0 %vm630_vm0, %v629_v0  ;;  %v538_v3 = vld [vmem:[#allocation2 + $0x28] sm:$0xff]   ;;  %v544_v4 = vld [vmem:[#allocation4 + $0x38] sm:$0xff]   ;;  %v539_v5 = vld [vmem:[#allocation2 + $0x20] sm:$0xff]  }
  0x26   :  { %489 = vmatprep.subr.bf16.mxu1 %v629_v0  ;;  %505 = vmatprep.mubr.msk.bf16.mxu1 %vm630_vm0, %v629_v0  ;;  %v545_v6 = vld [vmem:[#allocation4 + $0x30] sm:$0xff]   ;;  %v540_v7 = vld [vmem:[#allocation2 + $0x18] sm:$0xff]   ;;  %v546_v8 = vld [vmem:[#allocation4 + $0x28] sm:$0xff]  }
  0x27   :  { %470 = vmatpush3.bf16.msra.mxu0 %v536_v1  ;;  %490 = vmatpush3.bf16.msra.mxu1 %v544_v4  ;;  %v541_v9 = vld [vmem:[#allocation2 + $0x10] sm:$0xff]   ;;  %v547_v10 = vld [vmem:[#allocation4 + $0x20] sm:$0xff]   ;;  %v542_v11 = vld [vmem:[#allocation2 + $0x8] sm:$0xff]  }
  0x28   :  { %471 = vmatprep.subr.bf16.mxu0 %v629_v0  ;;  %491 = vmatprep.subr.bf16.mxu1 %v629_v0  ;;  %v548_v12 = vld [vmem:[#allocation4 + $0x18] sm:$0xff]   ;;  %v543_v13 = vld [vmem:[#allocation2] sm:$0xff]   ;;  %v549_v15 = vld [vmem:[#allocation4 + $0x10] sm:$0xff]  }
  0x29   :  { %v68_v14 = vld [vmem:[%s725_s0] sm:$0xff]  ;;  %v550_v17 = vld [vmem:[#allocation4 + $0x8] sm:$0xff]   ;;  %v552_v19 = vld [vmem:[#allocation6 + $0x38] sm:$0xff]  }
  0x2a   :  { %v69_v16 = vpack.c.bf16 %v68_v14, %v68_v14  ;;  %v551_v18 = vld [vmem:[#allocation4] sm:$0xff]   ;;  %v553_v20 = vld [vmem:[#allocation6 + $0x30] sm:$0xff]   ;;  %v554_v21 = vld [vmem:[#allocation6 + $0x28] sm:$0xff]  }
  0x2b   :  { %472 = vmatpush3.bf16.msra.mxu0 %v537_v2  ;;  %492 = vmatpush3.bf16.msra.mxu1 %v545_v6  ;;  %v555_v22 = vld [vmem:[#allocation6 + $0x20] sm:$0xff]   ;;  %v556_v23 = vld [vmem:[#allocation6 + $0x18] sm:$0xff]   ;;  %v557_v24 = vld [vmem:[#allocation6 + $0x10] sm:$0xff]  }
  0x2c   :  { %473 = vmatprep.subr.bf16.mxu0 %v629_v0  ;;  %493 = vmatprep.subr.bf16.mxu1 %v629_v0  ;;  %v415_v25 = vld [vmem:[%s727_s2] ss:$0 sm:$0xff]  ;;  %v558_v33 = vld [vmem:[#allocation6 + $0x8] sm:$0xff]  }
  0x2d   :  { %v559_v34 = vld [vmem:[#allocation6] sm:$0xff]  }
  0x2e   :  { %v424_v35 = vld [vmem:[%s729_s4] ss:$0 sm:$0xff] }
  0x2f   :  { %474 = vmatpush3.bf16.msra.mxu0 %v538_v3  ;;  %494 = vmatpush3.bf16.msra.mxu1 %v546_v8  ;;  %v433_v43 = vld [vmem:[%s731_s6] ss:$0 sm:$0xff] }
  0x30   :  { %475 = vmatprep.subr.bf16.mxu0 %v629_v0  ;;  %495 = vmatprep.subr.bf16.mxu1 %v629_v0 }
  0x33   :  { %476 = vmatpush3.bf16.msra.mxu0 %v539_v5  ;;  %496 = vmatpush3.bf16.msra.mxu1 %v547_v10 }
  0x34   :  { %477 = vmatprep.subr.bf16.mxu0 %v629_v0  ;;  %497 = vmatprep.subr.bf16.mxu1 %v629_v0 }
  0x37   :  { %478 = vmatpush3.bf16.msra.mxu0 %v540_v7  ;;  %498 = vmatpush3.bf16.msra.mxu1 %v548_v12 }
  0x38   :  { %479 = vmatprep.subr.bf16.mxu0 %v629_v0  ;;  %499 = vmatprep.subr.bf16.mxu1 %v629_v0 }
  0x3b   :  { %480 = vmatpush3.bf16.msra.mxu0 %v541_v9  ;;  %500 = vmatpush3.bf16.msra.mxu1 %v549_v15 }
  0x3c   :  { %481 = vmatprep.subr.bf16.mxu0 %v629_v0  ;;  %501 = vmatprep.subr.bf16.mxu1 %v629_v0 }
  0x3f   :  { %482 = vmatpush3.bf16.msra.mxu0 %v542_v11  ;;  %502 = vmatpush3.bf16.msra.mxu1 %v550_v17 }
  0x40   :  { %483 = vmatprep.subr.bf16.mxu0 %v629_v0  ;;  %503 = vmatprep.subr.bf16.mxu1 %v629_v0 }
  0x43   :  { %484 = vmatpush3.bf16.msra.mxu0 %v543_v13  ;;  %504 = vmatpush3.bf16.msra.mxu1 %v551_v18 }
  0x44   :  { %509 = vmatprep.subr.bf16.mxu0 %v629_v0 }
  0x46   :  { %486 = vmatmul.mubr.bf16.vlgmr.msra.gmra.mxu0 %v69_v16 }
  0x47   :  { %525 = vmatprep.mubr.msk.bf16.mxu0 %vm630_vm0, %v629_v0  ;;  %510 = vmatpush3.bf16.msra.mxu0 %v552_v19 }
  0x48   :  { %511 = vmatprep.subr.bf16.mxu0 %v629_v0 }
  0x4b   :  { %512 = vmatpush3.bf16.msra.mxu0 %v553_v20 }
  0x4c   :  { %513 = vmatprep.subr.bf16.mxu0 %v629_v0 }
  0x4f   :  { %514 = vmatpush3.bf16.msra.mxu0 %v554_v21 }
  0x50   :  { %515 = vmatprep.subr.bf16.mxu0 %v629_v0 }
  0x53   :  { %516 = vmatpush3.bf16.msra.mxu0 %v555_v22 }
  0x54   :  { %517 = vmatprep.subr.bf16.mxu0 %v629_v0 }
  0x57   :  { %518 = vmatpush3.bf16.msra.mxu0 %v556_v23 }
  0x58   :  { %519 = vmatprep.subr.bf16.mxu0 %v629_v0 }
  0x5b   :  { %520 = vmatpush3.bf16.msra.mxu0 %v557_v24 }
  0x5c   :  { %521 = vmatprep.subr.bf16.mxu0 %v629_v0 }
  0x5f   :  { %522 = vmatpush3.bf16.msra.mxu0 %v558_v33 }
  0x60   :  { %523 = vmatprep.subr.bf16.mxu0 %v629_v0 }
  0x63   :  { %524 = vmatpush3.bf16.msra.mxu0 %v559_v34 }
 0x106   :  { %v175_v26 = vpop.f32.mrf.mxu0 }
 0x107   :  { %v176_v27 = vadd.f32 %v415_v25, %v175_v26 }
 0x108   :  { %v487_v28 = vpop.f32.mrf.mxu0 }
 0x109   :  { %v181_v29 = vmax.f32 %v176_v27, 0.0 }
 0x10a   :  { %v178_v30 = vpop.f32.mrf.mxu0 }
 0x10b   :  { %v182_v31 = vpack.c.bf16 %v181_v29, %v181_v29 }
 0x10c   :  { %v488_v32 = vpop.f32.mrf.mxu0 }
 0x10d   :  { %506 = vmatmul.mubr.bf16.vlgmr.msra.gmra.mxu1 %v182_v31 }
 0x1cd   :  { %v288_v36 = vpop.f32.mrf.mxu1 }
 0x1ce   :  { %v289_v37 = vadd.f32 %v424_v35, %v288_v36 }
 0x1cf   :  { %v507_v38 = vpop.f32.mrf.mxu1 }
 0x1d0   :  { %v294_v39 = vmax.f32 %v289_v37, 0.0 }
 0x1d1   :  { %v291_v40 = vpop.f32.mrf.mxu1 }
 0x1d2   :  { %v295_v41 = vpack.c.bf16 %v294_v39, %v294_v39 }
 0x1d3   :  { %v508_v42 = vpop.f32.mrf.mxu1 }
 0x1d4   :  { %526 = vmatmul.mubr.bf16.vlgmr.msra.gmra.mxu0 %v295_v41 }
 0x294   :  { %v401_v44 = vpop.f32.mrf.mxu0 }
 0x295   :  { %v402_v45 = vadd.f32 %v433_v43, %v401_v44 }
 0x296   :  { %v527_v46 = vpop.f32.mrf.mxu0 }
 0x297   :  { %v407_v47 = vmax.f32 %v402_v45, 0.0 }
 0x298   :  { %v404_v48 = vpop.f32.mrf.mxu0 }
 0x299   :  { %408 = vst [vmem:[%s732_s7] sm:$0xff] %v407_v47 }
 0x29a   :  { %v528_v49 = vpop.f32.mrf.mxu0 }
 0x29b   :  { %413 = vsyncpa [#allocation3], 1 }
 0x29c   :  { %414 = vsyncpa [#allocation5], 1 }

</bundles_post_ra>
